<compile_context>
chip_gen: v6e
topology: v6e:2x2x1
jax: 0.10.0
libtpu: 0.0.40
codegen_flags: <defaults>
</compile_context>

<pallas_src>
import math
from functools import partial

import numpy as np
import jax
import jax.numpy as jnp
from jax import lax
from jax.experimental import pallas as pl
from jax.experimental.pallas import tpu as pltpu

BN_EPS = 1e-5  # PyTorch BatchNorm2d default


def _compiler_params(semantics):
    return pltpu.CompilerParams(dimension_semantics=semantics,
                                vmem_limit_bytes=32 * 1024 * 1024)


# ---------------------------------------------------------------------------
# Kernel 1: 3x3 conv as a single K=9*Cin im2col matmul + BN1 sum / sumsq
# partials.  Layout: channels on sublanes, flattened padded pixels on lanes.
# ---------------------------------------------------------------------------
def _conv3x3_stats_kernel(x_ref, w_ref, m_ref, z_ref, s_ref, q_ref, col_ref,
                          *, wp, cin):
    # x_ref: (1, Cin, Qe)   zero-padded (1px border + 1 flat elem each end)
    # w_ref: (Cout, 9*Cin)  tap-major flattened 3x3 weights
    # m_ref: (1, Pp)        1.0 on valid (non-pad) columns
    # col_ref: (9*Cin, Pp)  VMEM scratch for the im2col slab
    cout, pp = z_ref.shape[1], z_ref.shape[2]
    x = x_ref[0]                                            # (Cin, Qe)
    for dy in range(3):
        for dx in range(3):
            t = dy * 3 + dx
            start = dy * wp + dx                            # static lane offset
            col_ref[t * cin:(t + 1) * cin, :] = x[:, start:start + pp]
    acc = jnp.dot(w_ref[...], col_ref[...],
                  preferred_element_type=jnp.float32)       # (Cout, Pp)
    acc = acc * m_ref[...]                                  # zero pad columns
    z_ref[...] = acc.reshape(1, cout, pp)
    s_ref[...] = jnp.sum(acc, axis=1, keepdims=True).reshape(1, cout, 1)
    q_ref[...] = jnp.sum(acc * acc, axis=1, keepdims=True).reshape(1, cout, 1)


# ---------------------------------------------------------------------------
# Kernel 2: fused BN1 (scale/shift) + ReLU + 1x1 conv (single matmul).
# ---------------------------------------------------------------------------
def _bn_relu_conv1x1_kernel(z_ref, sc_ref, sh_ref, w_ref, v_ref, *, apply_act):
    c2, pp = v_ref.shape[1], v_ref.shape[2]
    z = z_ref[0]                                            # (C1, Pp)
    if apply_act:
        z = jnp.maximum(z * sc_ref[...] + sh_ref[...], 0.0)
    v = jnp.dot(w_ref[...], z, preferred_element_type=jnp.float32)
    v_ref[...] = v.reshape(1, c2, pp)                       # lane-dense store


# ---------------------------------------------------------------------------
# Kernel 3: separable bilinear upsample (row-block tiled) + fused BN2 + ReLU,
# stored as a lane-dense flat (1, C, TH2*W2) block.
# ---------------------------------------------------------------------------
def _upsample_bn_relu_kernel(v_ref, rh_ref, rwp_ref, sc_ref, sh_ref, o_ref):
    _, c, h, wp = v_ref.shape
    th2 = rh_ref.shape[0]
    w2 = rwp_ref.shape[1]
    v = v_ref[0]                                            # (C, H, Wp)
    # TODO(synk): broadcast + batched dot pending safe sublane/major transpose.
    rh = jnp.broadcast_to(rh_ref[...], (c, th2, h))         # (C, TH2, H)
    vh = lax.dot_general(rh, v, (((2,), (1,)), ((0,), (0,))),
                         preferred_element_type=jnp.float32)        # (C,TH2,Wp)
    y = jnp.dot(vh.reshape(c * th2, wp), rwp_ref[...],
                preferred_element_type=jnp.float32)                 # (C*TH2,W2)
    y = y.reshape(c, th2, w2)
    y = jnp.maximum(y * sc_ref[...] + sh_ref[...], 0.0)
    for o in range(th2):                                    # fill flat block
        o_ref[0, :, o * w2:(o + 1) * w2] = y[:, o, :]


# ---------------------------------------------------------------------------
# Wrappers
# ---------------------------------------------------------------------------
def _interp_coords(n_in, n_out):
    # F.interpolate(..., mode='bilinear', align_corners=True)
    if n_out == 1:
        src = np.zeros((1,), np.float64)
    else:
        src = np.arange(n_out, dtype=np.float64) * (n_in - 1) / (n_out - 1)
    lo = np.clip(np.floor(src).astype(np.int64), 0, n_in - 1)
    hi = np.minimum(lo + 1, n_in - 1)
    frac = (src - lo).astype(np.float32)
    return lo, hi, frac


def _interp_matrix(n_in, n_out):
    lo, hi, f = _interp_coords(n_in, n_out)
    r = np.zeros((n_out, n_in), np.float32)
    r[np.arange(n_out), lo] += 1.0 - f
    r[np.arange(n_out), hi] += f
    return r


def _row_block(h2, w2):
    # largest output row block that keeps the flat store a multiple of 128 lanes
    for cand in (64, 32, 16, 8):
        if h2 % cand == 0 and cand < h2 and (cand * w2) % 128 == 0:
            return cand
    return h2


def conv3x3_stats(x_nchw, w_oihw):
    n, cin, h, w = x_nchw.shape
    cout = w_oihw.shape[0]
    wp = w + 2
    pp = h * wp
    qe = (h + 2) * wp + 2
    xp = jnp.pad(x_nchw, ((0, 0), (0, 0), (1, 1), (1, 1)))
    xq = jnp.pad(xp.reshape(n, cin, (h + 2) * wp), ((0, 0), (0, 0), (1, 1)))
    wf = jnp.transpose(w_oihw, (0, 2, 3, 1)).reshape(cout, 9 * cin)
    col = np.arange(pp) % wp
    mask = jnp.asarray(((col >= 1) & (col <= w)).astype(np.float32).reshape(1, pp))

    return pl.pallas_call(
        partial(_conv3x3_stats_kernel, wp=wp, cin=cin),
        grid=(n,),
        in_specs=[
            pl.BlockSpec((1, cin, qe), lambda i: (i, 0, 0)),
            pl.BlockSpec((cout, 9 * cin), lambda i: (0, 0)),
            pl.BlockSpec((1, pp), lambda i: (0, 0)),
        ],
        out_specs=[
            pl.BlockSpec((1, cout, pp), lambda i: (i, 0, 0)),
            pl.BlockSpec((1, cout, 1), lambda i: (i, 0, 0)),
            pl.BlockSpec((1, cout, 1), lambda i: (i, 0, 0)),
        ],
        out_shape=[
            jax.ShapeDtypeStruct((n, cout, pp), jnp.float32),
            jax.ShapeDtypeStruct((n, cout, 1), jnp.float32),
            jax.ShapeDtypeStruct((n, cout, 1), jnp.float32),
        ],
        scratch_shapes=[pltpu.VMEM((9 * cin, pp), jnp.float32)],
        compiler_params=_compiler_params(("parallel",)),
    )(xq, wf, mask)


def bn_relu_conv1x1(z, scale, shift, w1, apply_act):
    n, c1, pp = z.shape
    c2 = w1.shape[0]
    return pl.pallas_call(
        partial(_bn_relu_conv1x1_kernel, apply_act=apply_act),
        grid=(n,),
        in_specs=[
            pl.BlockSpec((1, c1, pp), lambda i: (i, 0, 0)),
            pl.BlockSpec((c1, 1), lambda i: (0, 0)),
            pl.BlockSpec((c1, 1), lambda i: (0, 0)),
            pl.BlockSpec((c2, c1), lambda i: (0, 0)),
        ],
        out_specs=pl.BlockSpec((1, c2, pp), lambda i: (i, 0, 0)),
        out_shape=jax.ShapeDtypeStruct((n, c2, pp), jnp.float32),
        compiler_params=_compiler_params(("parallel",)),
    )(z, scale.reshape(c1, 1), shift.reshape(c1, 1), w1)


def upsample_bn_relu(v, rh, rwp, sc2, sh2):
    n, c2, pp = v.shape
    wp = rwp.shape[0]
    h = pp // wp
    h2 = rh.shape[0]
    w2 = rwp.shape[1]
    th2 = _row_block(h2, w2)
    v4 = v.reshape(n, c2, h, wp)                      # free HBM reinterpret
    out = pl.pallas_call(
        _upsample_bn_relu_kernel,
        grid=(n, h2 // th2),
        in_specs=[
            pl.BlockSpec((1, c2, h, wp), lambda i, r: (i, 0, 0, 0)),
            pl.BlockSpec((th2, h), lambda i, r: (r, 0)),
            pl.BlockSpec((wp, w2), lambda i, r: (0, 0)),
            pl.BlockSpec((c2, 1, 1), lambda i, r: (0, 0, 0)),
            pl.BlockSpec((c2, 1, 1), lambda i, r: (0, 0, 0)),
        ],
        out_specs=pl.BlockSpec((1, c2, th2 * w2), lambda i, r: (i, 0, r)),
        out_shape=jax.ShapeDtypeStruct((n, c2, h2 * w2), jnp.float32),
        compiler_params=_compiler_params(("parallel", "parallel")),
    )(v4, rh, rwp, sc2.reshape(c2, 1, 1), sh2.reshape(c2, 1, 1))
    return out


def decoder_block_forward(x_nchw, params, scale=2, last=False):
    n, cin, h, w = x_nchw.shape
    wp = w + 2
    pp = h * wp
    s = scale if scale > 1 else 1
    h2, w2 = h * s, w * s

    # Interpolation operators (align_corners=True).  Pad columns are folded in
    # as zero rows of rwp, so downstream kernels never slice off the padding.
    rh_np = _interp_matrix(h, h2)                        # (H2, H)
    rw_np = _interp_matrix(w, w2)                        # (W2, W)
    rwp_np = np.zeros((wp, w2), np.float32)
    rwp_np[1:w + 1, :] = rw_np.T                         # (Wp, W2), zero pads
    gh_np = rh_np.T @ rh_np                              # (H, H)   H-Gram
    gw_np = rwp_np @ rwp_np.T                            # (Wp, Wp) W-Gram
    a_h = jnp.asarray(rh_np.sum(axis=0))                 # (H,)
    b_w = jnp.asarray(rwp_np.sum(axis=1))                # (Wp,) zero at pads
    gh = jnp.asarray(gh_np)
    gw = jnp.asarray(gw_np)
    rh = jnp.asarray(rh_np)
    rwp = jnp.asarray(rwp_np)

    if not last:
        z, s1, q1 = conv3x3_stats(x_nchw, params["w3"])
        cnt1 = float(n * h * w)
        mean1 = jnp.sum(s1, axis=(0, 2)) / cnt1
        var1 = jnp.maximum(jnp.sum(q1, axis=(0, 2)) / cnt1 - mean1 * mean1, 0.0)
        sc1 = params["g1"] * lax.rsqrt(var1 + BN_EPS)
        sh1 = params["b1"] - mean1 * sc1
        apply_act = True
    else:
        z = jnp.pad(x_nchw, ((0, 0), (0, 0), (0, 0), (1, 1))).reshape(n, cin, pp)
        sc1 = jnp.ones((cin,), jnp.float32)
        sh1 = jnp.zeros((cin,), jnp.float32)
        apply_act = False

    # 1x1 conv hoisted before the (linear, channel-independent) upsample.
    v = bn_relu_conv1x1(z, sc1, sh1, params["w1"], apply_act)    # (N, C2, Pp)
    c2 = params["w1"].shape[0]

    # BN2 batch statistics of the (virtual) upsampled tensor in closed form:
    #   sum(y)   = <v, a b^T>,   sumsq(y) = <v, Gh v Gw>   (per channel),
    # fused by XLA with the scale/shift fold - no H2/W2-sized intermediates.
    v4 = v.reshape(n, c2, h, wp)
    s2 = jnp.einsum('ncij,i,j->c', v4, a_h, b_w)
    u = jnp.einsum('ncij,jk->ncik', v4, gw)
    t = jnp.einsum('ik,nckj->ncij', gh, u)
    q2 = jnp.sum(v4 * t, axis=(0, 2, 3))
    cnt2 = float(n * h2 * w2)
    mean2 = s2 / cnt2
    var2 = jnp.maximum(q2 / cnt2 - mean2 * mean2, 0.0)
    sc2 = params["g2"] * lax.rsqrt(var2 + BN_EPS)
    sh2 = params["b2"] - mean2 * sc2

    out_flat = upsample_bn_relu(v, rh, rwp, sc2, sh2)            # (N, C2, H2*W2)
    return out_flat.reshape(n, c2, h2, w2)


# ---------------------------------------------------------------------------
# Deterministic parameter init (matches the module's shapes / init scheme)
# ---------------------------------------------------------------------------
def init_params(key, in_planes, out_planes):
    k1, k2, k3, k4 = jax.random.split(key, 4)
    bound3 = math.sqrt(6.0 / (in_planes * 9))            # kaiming_uniform_, a=0
    w3 = jax.random.uniform(k1, (in_planes, in_planes, 3, 3), jnp.float32,
                            -bound3, bound3)             # OIHW
    bound1 = math.sqrt(6.0 / in_planes)
    w1 = jax.random.uniform(k2, (out_planes, in_planes), jnp.float32,
                            -bound1, bound1)             # (Cout, Cin)
    g1 = 1.0 + 0.02 * jax.random.normal(k3, (in_planes,), jnp.float32)
    b1 = jnp.zeros((in_planes,), jnp.float32)
    g2 = 1.0 + 0.02 * jax.random.normal(k4, (out_planes,), jnp.float32)
    b2 = jnp.zeros((out_planes,), jnp.float32)
    return dict(w3=w3, g1=g1, b1=b1, w1=w1, g2=g2, b2=b2)


# ---------------------------------------------------------------------------
# Pure-JAX reference (independent path, original op order) for a sanity check
# ---------------------------------------------------------------------------
def _bn_relu_ref(x, g, b):
    mean = jnp.mean(x, axis=(0, 2, 3), keepdims=True)
    var = jnp.mean(jnp.square(x - mean), axis=(0, 2, 3), keepdims=True)
    y = (x - mean) * lax.rsqrt(var + BN_EPS) * g.reshape(1, -1, 1, 1) \
        + b.reshape(1, -1, 1, 1)
    return jnp.maximum(y, 0.0)


def reference_forward(x, params, scale=2, last=False):
    if not last:
        x = lax.conv_general_dilated(x, params["w3"], (1, 1), ((1, 1), (1, 1)),
                                     dimension_numbers=("NCHW", "OIHW", "NCHW"))
        x = _bn_relu_ref(x, params["g1"], params["b1"])
    if scale > 1:
        _, _, h, w = x.shape
        rh = jnp.asarray(_interp_matrix(h, h * scale))
        rw = jnp.asarray(_interp_matrix(w, w * scale))
        x = jnp.einsum("oh,nchw->ncow", rh, x)
        x = jnp.einsum("pw,nchw->nchp", rw, x)
    y = jnp.einsum("oc,nchw->nohw", params["w1"], x)
    return _bn_relu_ref(y, params["g2"], params["b2"])


if __name__ == "__main__":
    key = jax.random.PRNGKey(0)
    kx, kp = jax.random.split(key)

    in_planes, out_planes = 4, 8
    n, h, w = 2, 16, 16
    scale = 2

    x = jax.random.normal(kx, (n, in_planes, h, w), jnp.float32)  # NCHW
    params = init_params(kp, in_planes, out_planes)

    out = decoder_block_forward(x, params, scale=scale, last=False)
    out = jax.block_until_ready(out)
    assert out.shape == (n, out_planes, h * scale, w * scale), out.shape

    ref = reference_forward(x, params, scale=scale, last=False)
    np.testing.assert_allclose(np.asarray(out), np.asarray(ref),
                               rtol=2e-2, atol=2e-2)
    print("KERNEL_OK")
</pallas_src>

<mosaic_0001>
module attributes {stable_mosaic.version = 11 : i64} {
  func.func @_conv3x3_stats_kernel(%arg0: i32, %arg1: memref<1x4x326xf32, #tpu.memory_space<vmem>>, %arg2: memref<4x36xf32, #tpu.memory_space<vmem>>, %arg3: memref<1x288xf32, #tpu.memory_space<vmem>>, %arg4: memref<1x4x288xf32, #tpu.memory_space<vmem>>, %arg5: memref<1x4x1xf32, #tpu.memory_space<vmem>>, %arg6: memref<1x4x1xf32, #tpu.memory_space<vmem>>, %arg7: memref<36x288xf32, #tpu.memory_space<vmem>>) attributes {dimension_semantics = [#tpu.dimension_semantics<parallel>], iteration_bounds = array<i64: 2>, scalar_prefetch = 0 : i64, scratch_operands = 1 : i64, tpu.core_type = #tpu.core_type<tc>, window_params = [{transform_indices = @transform_0, window_bounds = array<i64: 1, 4, 326>}, {pipeline_mode = #tpu.pipeline_mode<synchronous>, transform_indices = @transform_1, window_bounds = array<i64: 4, 36>}, {pipeline_mode = #tpu.pipeline_mode<synchronous>, transform_indices = @transform_2, window_bounds = array<i64: 1, 288>}, {transform_indices = @transform_3, window_bounds = array<i64: 1, 4, 288>}, {transform_indices = @transform_4, window_bounds = array<i64: 1, 4, 1>}, {transform_indices = @transform_5, window_bounds = array<i64: 1, 4, 1>}]} {
    %c0 = arith.constant 0 : index
    %c0_0 = arith.constant 0 : index
    %c0_1 = arith.constant 0 : index
    %0 = vector.load %arg1[%c0, %c0_0, %c0_1] : memref<1x4x326xf32, #tpu.memory_space<vmem>>, vector<1x4x326xf32>
    %1 = vector.shape_cast %0 : vector<1x4x326xf32> to vector<4x326xf32>
    %2 = vector.extract_strided_slice %1 {offsets = [0, 0], sizes = [4, 288], strides = [1, 1]} : vector<4x326xf32> to vector<4x288xf32>
    %c0_2 = arith.constant 0 : index
    %c0_3 = arith.constant 0 : index
    %3 = vector.load %arg7[%c0_2, %c0_3] : memref<36x288xf32, #tpu.memory_space<vmem>>, vector<4x288xf32>
    tpu.vector_store %arg7[%c0_2, %c0_3], %2 {strides = array<i32>} : memref<36x288xf32, #tpu.memory_space<vmem>>, vector<4x288xf32>,
    %4 = vector.extract_strided_slice %1 {offsets = [0, 1], sizes = [4, 288], strides = [1, 1]} : vector<4x326xf32> to vector<4x288xf32>
    %c4 = arith.constant 4 : index
    %c0_4 = arith.constant 0 : index
    %5 = vector.load %arg7[%c4, %c0_4] : memref<36x288xf32, #tpu.memory_space<vmem>>, vector<4x288xf32>
    tpu.vector_store %arg7[%c4, %c0_4], %4 {strides = array<i32>} : memref<36x288xf32, #tpu.memory_space<vmem>>, vector<4x288xf32>,
    %6 = vector.extract_strided_slice %1 {offsets = [0, 2], sizes = [4, 288], strides = [1, 1]} : vector<4x326xf32> to vector<4x288xf32>
    %c8 = arith.constant 8 : index
    %c0_5 = arith.constant 0 : index
    %7 = vector.load %arg7[%c8, %c0_5] : memref<36x288xf32, #tpu.memory_space<vmem>>, vector<4x288xf32>
    tpu.vector_store %arg7[%c8, %c0_5], %6 {strides = array<i32>} : memref<36x288xf32, #tpu.memory_space<vmem>>, vector<4x288xf32>,
    %8 = vector.extract_strided_slice %1 {offsets = [0, 18], sizes = [4, 288], strides = [1, 1]} : vector<4x326xf32> to vector<4x288xf32>
    %c12 = arith.constant 12 : index
    %c0_6 = arith.constant 0 : index
    %9 = vector.load %arg7[%c12, %c0_6] : memref<36x288xf32, #tpu.memory_space<vmem>>, vector<4x288xf32>
    tpu.vector_store %arg7[%c12, %c0_6], %8 {strides = array<i32>} : memref<36x288xf32, #tpu.memory_space<vmem>>, vector<4x288xf32>,
    %10 = vector.extract_strided_slice %1 {offsets = [0, 19], sizes = [4, 288], strides = [1, 1]} : vector<4x326xf32> to vector<4x288xf32>
    %c16 = arith.constant 16 : index
    %c0_7 = arith.constant 0 : index
    %11 = vector.load %arg7[%c16, %c0_7] : memref<36x288xf32, #tpu.memory_space<vmem>>, vector<4x288xf32>
    tpu.vector_store %arg7[%c16, %c0_7], %10 {strides = array<i32>} : memref<36x288xf32, #tpu.memory_space<vmem>>, vector<4x288xf32>,
    %12 = vector.extract_strided_slice %1 {offsets = [0, 20], sizes = [4, 288], strides = [1, 1]} : vector<4x326xf32> to vector<4x288xf32>
    %c20 = arith.constant 20 : index
    %c0_8 = arith.constant 0 : index
    %13 = vector.load %arg7[%c20, %c0_8] : memref<36x288xf32, #tpu.memory_space<vmem>>, vector<4x288xf32>
    tpu.vector_store %arg7[%c20, %c0_8], %12 {strides = array<i32>} : memref<36x288xf32, #tpu.memory_space<vmem>>, vector<4x288xf32>,
    %14 = vector.extract_strided_slice %1 {offsets = [0, 36], sizes = [4, 288], strides = [1, 1]} : vector<4x326xf32> to vector<4x288xf32>
    %c24 = arith.constant 24 : index
    %c0_9 = arith.constant 0 : index
    %15 = vector.load %arg7[%c24, %c0_9] : memref<36x288xf32, #tpu.memory_space<vmem>>, vector<4x288xf32>
    tpu.vector_store %arg7[%c24, %c0_9], %14 {strides = array<i32>} : memref<36x288xf32, #tpu.memory_space<vmem>>, vector<4x288xf32>,
    %16 = vector.extract_strided_slice %1 {offsets = [0, 37], sizes = [4, 288], strides = [1, 1]} : vector<4x326xf32> to vector<4x288xf32>
    %c28 = arith.constant 28 : index
    %c0_10 = arith.constant 0 : index
    %17 = vector.load %arg7[%c28, %c0_10] : memref<36x288xf32, #tpu.memory_space<vmem>>, vector<4x288xf32>
    tpu.vector_store %arg7[%c28, %c0_10], %16 {strides = array<i32>} : memref<36x288xf32, #tpu.memory_space<vmem>>, vector<4x288xf32>,
    %18 = vector.extract_strided_slice %1 {offsets = [0, 38], sizes = [4, 288], strides = [1, 1]} : vector<4x326xf32> to vector<4x288xf32>
    %c32 = arith.constant 32 : index
    %c0_11 = arith.constant 0 : index
    %19 = vector.load %arg7[%c32, %c0_11] : memref<36x288xf32, #tpu.memory_space<vmem>>, vector<4x288xf32>
    tpu.vector_store %arg7[%c32, %c0_11], %18 {strides = array<i32>} : memref<36x288xf32, #tpu.memory_space<vmem>>, vector<4x288xf32>,
    %c0_12 = arith.constant 0 : index
    %c0_13 = arith.constant 0 : index
    %20 = vector.load %arg2[%c0_12, %c0_13] : memref<4x36xf32, #tpu.memory_space<vmem>>, vector<4x36xf32>
    %c0_14 = arith.constant 0 : index
    %c0_15 = arith.constant 0 : index
    %21 = vector.load %arg7[%c0_14, %c0_15] : memref<36x288xf32, #tpu.memory_space<vmem>>, vector<36x288xf32>
    %cst = arith.constant dense<0.000000e+00> : vector<4x288xf32>
    %22 = tpu.matmul %20, %21, %cst {dimension_numbers = #tpu.dot_dimension_numbers<[1], [0], [0], [1], [0, 0, 1, 1], [], []>} : vector<4x36xf32>, vector<36x288xf32>, vector<4x288xf32> -> vector<4x288xf32>
    %c0_16 = arith.constant 0 : index
    %c0_17 = arith.constant 0 : index
    %23 = vector.load %arg3[%c0_16, %c0_17] : memref<1x288xf32, #tpu.memory_space<vmem>>, vector<1x288xf32>
    %24 = vector.broadcast %23 : vector<1x288xf32> to vector<4x288xf32>
    %25 = arith.mulf %22, %24 : vector<4x288xf32>
    %26 = vector.shape_cast %25 : vector<4x288xf32> to vector<1x4x288xf32>
    %c0_18 = arith.constant 0 : index
    %c0_19 = arith.constant 0 : index
    %c0_20 = arith.constant 0 : index
    %27 = vector.load %arg4[%c0_18, %c0_19, %c0_20] : memref<1x4x288xf32, #tpu.memory_space<vmem>>, vector<1x4x288xf32>
    tpu.vector_store %arg4[%c0_18, %c0_19, %c0_20], %26 {strides = array<i32>} : memref<1x4x288xf32, #tpu.memory_space<vmem>>, vector<1x4x288xf32>,
    %cst_21 = arith.constant dense<0.000000e+00> : vector<4xf32>
    %28 = vector.multi_reduction <add>, %25, %cst_21 [1] : vector<4x288xf32> to vector<4xf32>
    %29 = vector.shape_cast %28 : vector<4xf32> to vector<4x1xf32>
    %30 = vector.shape_cast %29 : vector<4x1xf32> to vector<1x4x1xf32>
    %c0_22 = arith.constant 0 : index
    %c0_23 = arith.constant 0 : index
    %c0_24 = arith.constant 0 : index
    %31 = vector.load %arg5[%c0_22, %c0_23, %c0_24] : memref<1x4x1xf32, #tpu.memory_space<vmem>>, vector<1x4x1xf32>
    tpu.vector_store %arg5[%c0_22, %c0_23, %c0_24], %30 {strides = array<i32>} : memref<1x4x1xf32, #tpu.memory_space<vmem>>, vector<1x4x1xf32>,
    %32 = arith.mulf %25, %25 : vector<4x288xf32>
    %cst_25 = arith.constant dense<0.000000e+00> : vector<4xf32>
    %33 = vector.multi_reduction <add>, %32, %cst_25 [1] : vector<4x288xf32> to vector<4xf32>
    %34 = vector.shape_cast %33 : vector<4xf32> to vector<4x1xf32>
    %35 = vector.shape_cast %34 : vector<4x1xf32> to vector<1x4x1xf32>
    %c0_26 = arith.constant 0 : index
    %c0_27 = arith.constant 0 : index
    %c0_28 = arith.constant 0 : index
    %36 = vector.load %arg6[%c0_26, %c0_27, %c0_28] : memref<1x4x1xf32, #tpu.memory_space<vmem>>, vector<1x4x1xf32>
    tpu.vector_store %arg6[%c0_26, %c0_27, %c0_28], %35 {strides = array<i32>} : memref<1x4x1xf32, #tpu.memory_space<vmem>>, vector<1x4x1xf32>,
    return
  }
  func.func @transform_0(%arg0: i32) -> (i32, i32, i32) {
    %c0_i32 = arith.constant 0 : i32
    %c0_i32_0 = arith.constant 0 : i32
    %c0_i32_1 = arith.constant 0 : i32
    return %arg0, %c0_i32, %c0_i32_0 : i32, i32, i32
  }
  func.func @transform_1(%arg0: i32) -> (i32, i32) {
    %c0_i32 = arith.constant 0 : i32
    %c0_i32_0 = arith.constant 0 : i32
    %c0_i32_1 = arith.constant 0 : i32
    return %c0_i32, %c0_i32_0 : i32, i32
  }
  func.func @transform_2(%arg0: i32) -> (i32, i32) {
    %c0_i32 = arith.constant 0 : i32
    %c0_i32_0 = arith.constant 0 : i32
    %c0_i32_1 = arith.constant 0 : i32
    return %c0_i32, %c0_i32_0 : i32, i32
  }
  func.func @transform_3(%arg0: i32) -> (i32, i32, i32) {
    %c0_i32 = arith.constant 0 : i32
    %c0_i32_0 = arith.constant 0 : i32
    %c0_i32_1 = arith.constant 0 : i32
    return %arg0, %c0_i32, %c0_i32_0 : i32, i32, i32
  }
  func.func @transform_4(%arg0: i32) -> (i32, i32, i32) {
    %c0_i32 = arith.constant 0 : i32
    %c0_i32_0 = arith.constant 0 : i32
    %c0_i32_1 = arith.constant 0 : i32
    return %arg0, %c0_i32, %c0_i32_0 : i32, i32, i32
  }
  func.func @transform_5(%arg0: i32) -> (i32, i32, i32) {
    %c0_i32 = arith.constant 0 : i32
    %c0_i32_0 = arith.constant 0 : i32
    %c0_i32_1 = arith.constant 0 : i32
    return %arg0, %c0_i32, %c0_i32_0 : i32, i32, i32
  }
}

</mosaic_0001>

<bundles_post_ra>
// kernel: tpu_custom_call.1
= control target key start
LH: loop header
LB: loop body
LE: loop exit
PB: predicated region body
PF: predicated region fallthrough
CT: control target
= control target key end

     0   :  { %11 = vsyncpa [#allocation4], 0  ;;  %s1267_s0 = inlined_call_operand.hbm [shape: f32[2,4,326], index: 0, kind: input, shape index: {}]   ;;  %s1268_s1 = inlined_call_operand.hbm [shape: f32[4,36], index: 1, kind: input, shape index: {}]   ;;  %s1269_s2 = inlined_call_operand.vmem [shape: f32[1,288], index: 2, kind: input, shape index: {}]   ;;  %s1270_s3 = inlined_call_operand.hbm [shape: f32[2,4,288], index: 3, kind: output, shape index: {0}]   ;;  %s1271_s4 = inlined_call_operand.vmem [shape: f32[2,4,1], index: 4, kind: output, shape index: {1}]   ;;  %s1272_s5 = inlined_call_operand.vmem [shape: f32[2,4,1], index: 5, kind: output, shape index: {2}]  }
   0x1   :  { %13 = vsyncpa [#allocation4 + $0x1], 0 }
   0x2   :  { %14 = vsyncpa [#allocation7], 0 }
   0x3   :  { %15 = vsyncpa [#allocation5], 0 }
   0x4   :  { %17 = vsyncpa [#allocation5 + $0x1], 0  ;;  %s1058_s18 = smov 0   ;;  %s1060_s19 = smov 0  }
   0x5   :  { %s1062_s20 = smov 0   ;;  %s1064_s21 = smov 0  }
   0x6 LB: > { %s1079_s22 = sadd.s32 4294967295, %s1013_s21   ;;  %s782_s23 = sadd.s32 4294967294, %s1013_s21   ;;  %s1013_s21 = sphi %s1064_s21, %s1295_s21   ;;  %s1009_s20 = sphi %s1062_s20, %s1294_s20   ;;  %s1005_s19 = sphi %s1060_s19, %s1293_s19   ;;  %s1001_s18 = sphi %s1058_s18, %s1292_s18  }
   0x7   : > { %p43_p0 = scmp.ne.s32.totalorder %s1005_s19, %s1001_s18  ;;  %p1273_p1 = scmp.eq.s32.totalorder %s1079_s22, 0 }
   0x8   : > { %p115_p3 = scmp.eq.s32.totalorder %s782_s23, 1  ;;  %p783_p5 = scmp.ge.s32.totalorder %s1013_s21, 1 }
   0x9   : > { %p1088_p4 = por %p1273_p1, %p43_p0  ;;  %p174_p7 = scmp.lt.s32.totalorder %s1013_s21, 3 }
   0xa   : > { %p1093_p6 = por %p115_p3, %p43_p0  ;;  %s1015_s27 = smov [#allocation6]  }
   0xb   : > { %s1277_s24 = scalar_select %p1088_p4, 1, 0 }
   0xc   : > { %s1278_s25 = scalar_select %p1093_p6, 1, 0 }
   0xd   : > { %p1098_p8 = pnand %p783_p5, %p174_p7  ;;  %s187_s28 = sshll.u32 %s1015_s27, 4  ;;  %s188_s28 = int_to_ptr.vmem [resolvable:$true] %s187_s28 }
   0xe   : > { %s1106_s29 = sadd.s32 1, %s1013_s21   ;;  %s30_s8 = sadd.s32 1, %s1009_s20 }
   0xf   : > { %s1279_s26 = scalar_select %p1098_p8, 1, 0 }
  0x10   : > { %p830_p10 = pneg %p1098_p8  ;;  %s27_s6 = ssub.s32 %s1013_s21, %s1106_s29 }
  0x11   : > { %p1116_p12 = scmp.eq.s32.totalorder %s27_s6, 0  ;;  %p37_p13 = scmp.ne.s32.totalorder %s1009_s20, %s1005_s19 }
  0x12   : > { %p1110_p11 = pnand %p830_p10, %p1273_p1  ;;  %s902_s9 = scalar_lea.vmem %s188_s28, 64 }
  0x13   : > { %p903_p3 = scmp.ne.s32.totalorder %s188_s28, %s902_s9  ;;  %p910_p9 = scmp.lt.s32.totalorder %s188_s28, %s188_s28 }
  0x14   : > { %p893_p0 = pneg %p1110_p11  ;;  %p911_p2 = scmp.lt.s32.totalorder %s902_s9, %s902_s9 }
  0x16   : > { %p905_p5 = pnand %p903_p3, %p893_p0  ;;  %p912_p10 = por %p911_p2, %p910_p9 }
  0x18   : > { %p906_p7 = pneg %p905_p5 }
  0x1a   : > { %p913_p1 = pnand %p912_p10, %p906_p7 }
  0x1c   : > { %916 = shalt.err (!%p913_p1)
}
  0x1d   : > { %833 = dma.hbm_to_vmem [thread:$0]  (!%p1110_p11), %s1268_s1, 64, %s188_s28, [#allocation7]  }
  0x1e   : > { %s1133_s12 = scalar_select %p1116_p12, %s1009_s20, %s30_s8  }
  0x1f   : > { %p38_p1 = scmp.eq.s32.totalorder %s1013_s21, 0  ;;  %p1282_p2 = scmp.eq.s32.totalorder %s1079_s22, 1 }
  0x20   : > { %p843_p0 = scmp.lt.s32.totalorder %s1013_s21, 2  ;;  %s201_s14 = sand.u32 1, %s1009_s20  }
  0x21   : > { %p1141_p9 = por %p1282_p2, %p37_p13  ;;  %p39_p3 = por %p38_p1, %p37_p13 }
  0x22   : > { %s818_s15 = smul.u32 12, %s201_s14  ;;  %s202_s7 = scalar_lea.sflag [#allocation4], %s201_s14 }
  0x23   : > { %s1283_s13 = scalar_select %p1141_p9, 1, 0 }
  0x24   : > { %s819_s16 = smul.u32 192, %s1013_s21  ;;  %p1151_p5 = pnand %p843_p0, %p39_p3 }
  0x25   : > { %s205_s30 = scalar_lea.vmem [#allocation3], %s818_s15  ;;  %s922_s11 = scalar_lea.hbm %s1267_s0, 384 }
  0x26   : > { %s1158_s28 = scalar_lea.hbm %s1267_s0, %s819_s16  ;;  %s213_s6 = sshll.u32 %s205_s30, 4  ;;  %s214_s6 = int_to_ptr.vmem [resolvable:$true] %s213_s6 }
  0x27   : > { %s917_s8 = scalar_lea.hbm %s1158_s28, 192  ;;  %p919_p12 = pneg %p1151_p5 }
  0x28   : > { %p918_p11 = scmp.ne.s32.totalorder %s1158_s28, %s917_s8  ;;  %p923_p10 = scmp.lt.s32.totalorder %s1158_s28, %s1267_s0 }
  0x29   : > { %p924_p1 = scmp.lt.s32.totalorder %s922_s11, %s917_s8 }
  0x2a   : > { %p920_p13 = pnand %p919_p12, %p918_p11 }
  0x2b   : > { %p925_p2 = por %p924_p1, %p923_p10 }
  0x2c   : > { %p921_p7 = pneg %p920_p13 }
  0x2e   : > { %p926_p0 = pnand %p925_p2, %p921_p7 }
  0x30   : > { %929 = shalt.err (!%p926_p0)
}
  0x31   : > { %s930_s15 = scalar_lea.vmem %s214_s6, 192  ;;  %s1016_s14 = smov [#allocation3]  }
  0x32   : > { %p931_p3 = scmp.ne.s32.totalorder %s214_s6, %s930_s15  ;;  %s935_s27 = sshll.u32 %s1016_s14, 4  ;;  %s936_s27 = int_to_ptr.vmem [resolvable:$false] %s935_s27 }
  0x33   : > { %s937_s30 = scalar_lea.vmem %s936_s27, 384  ;;  %p938_p11 = scmp.lt.s32.totalorder %s214_s6, %s936_s27 }
  0x34   : > { %p933_p6 = pnand %p931_p3, %p919_p12  ;;  %p939_p13 = scmp.lt.s32.totalorder %s937_s30, %s930_s15 }
  0x36   : > { %p934_p9 = pneg %p933_p6  ;;  %p940_p4 = por %p939_p13, %p938_p11 }
  0x38   : > { %p941_p8 = pnand %p940_p4, %p934_p9 }
  0x3a   : > { %944 = shalt.err (!%p941_p8)
}
  0x3b   : > { %837 = dma.hbm_to_vmem [thread:$0]  (!%p1151_p5), %s1158_s28, 192, %s214_s6, %s202_s7  }
  0x3c   : > { %p1285_p7 = scmp.ne.s32.totalorder %s1279_s26, 0 }
  0x3d   : > { %s1177_s8 = sand.u32 (!%p1285_p7), 1, %s1005_s19   ;;  %p1286_p4 = scmp.ne.s32.totalorder (!%p1285_p7), %s1277_s24, 0 }
  0x3e   : > { %222 = sbr.rel (%p1285_p7) target bundleno = 586 (0x24a), region = 32  ;;  %s225_s10 = scalar_lea.sflag (!%p1285_p7), [#allocation4], %s1177_s8 }
  0x3f   : > { %s820_s9 = smul.u32 (!%p1285_p7), 12, %s1177_s8 }
  0x41   : > { %s228_s11 = scalar_lea.vmem (!%p1285_p7), [#allocation3], %s820_s9 }
  0x43   : > { %988 = dma.done.wait (%p1286_p4), %s225_s10, 192  }
  0x44   : > { %990 = vsyncadd (%p1286_p4), %s225_s10, 4294967104  ;;  %p1287_p6 = scmp.eq.s32.totalorder %s1079_s22, 0 }
  0x46   : > { %992 = dma.done.wait (%p1287_p6), [#allocation7], 64   ;;  %p1288_p8 = pmov %p1287_p6 }
  0x47   : > { %v1017_v0 = vmov 0.0   ;;  %v276_v1 = vld [vmem:[%s228_s11 + $0x8] sm:$0xf]  ;;  %vm283_vm0 = vcmask 257024   ;;  %v275_v2 = vld [vmem:[%s228_s11] sm:$0xff]  ;;  %s1018_s26 = smov 90   ;;  %v581_v62 = vlaneseq }
  0x48   : > { %994 = vsyncadd (%p1288_p8), [#allocation7], 4294967232  ;;  %805 = vmatprep.subr.mxu1 %v1017_v0  ;;  %502 = vmatprep.mubr.f32.mxu0 %v1017_v0  ;;  %284 = vst.msk [vmem:[#allocation2 + $0x10] sm:$0xf] %vm283_vm0, %v276_v1  ;;  %v279_v3 = vcombine.high %v275_v2, %v275_v2  ;;  %s1019_s24 = smov 92   ;;  %s1020_s17 = smov 91   ;;  %v286_v4 = vcombine.low %v276_v1, %v276_v1 }
  0x49   : > { %397 = vrot.lane.b32.xlu0 %v276_v1, %s1018_s26  ;;  %393 = vrot.lane.b32.xlu1 %v275_v2, %s1018_s26  ;;  %281 = vst [vmem:[#allocation2] sm:$0xf] %v275_v2  ;;  %v285_v5 = vcombine.low %v275_v2, %v275_v2  ;;  %s1021_s28 = smov 109   ;;  %s1022_s6 = smov 108   ;;  %vm1026_vm1 = vmmov 0   ;;  %vm369_vm2 = vcmask 752640  }
  0x4a   : > { %282 = vst [vmem:[#allocation2 + $0x8] sm:$0xf] %v279_v3  ;;  %s1023_s7 = smov 126   ;;  %s1024_s23 = smov 110   ;;  %815 = vmatprep.mubr.msk.f32.mxu1 %vm1026_vm1, %v1017_v0  ;;  %vm399_vm3 = vcmask 736256   ;;  %vm428_vm4 = vcmask 1043456  }
  0x4b   : > { %s1025_s16 = smov 127   ;;  %vm301_vm5 = vcmask 261124   ;;  %vm384_vm6 = vcmask 744448   ;;  %vm339_vm7 = vcmask 891904   ;;  %vm354_vm8 = vcmask 883712   ;;  %s254_s27 = scalar_lea.vmem [#allocation8], %s820_s9 }
  0x4c   : > { %vm309_vm9 = vcmask 1031168   ;;  %vm324_vm10 = vcmask 900096   ;;  %vm293_vm11 = vcmask 1039360   ;;  %v408_v61 = vld [vmem:[#allocation6] sm:$0xf]  ;;  %vm424_vm12 = vcmask 293888  }
  0x4d   : > { %367 = vrot.lane.b32.xlu0 %v276_v1, %s1019_s24  ;;  %380 = vrot.lane.b32.xlu1 %v275_v2, %s1020_s17  ;;  %v582_v63 = vshrl.u32 %v581_v62, 7  ;;  %s821_s30 = smul.u32 192, %s1079_s22  ;;  %s648_s9 = sshll.u32 %s254_s27, 4  ;;  %s649_s9 = int_to_ptr.vmem [resolvable:$true] %s648_s9 }
  0x4e   : > { %p1289_p5 = scmp.ne.s32.totalorder %s1283_s13, 0 }
  0x51   : > { %365 = vrot.lane.b32.xlu1 %v279_v3, %s1019_s24  ;;  %395 = vrot.lane.b32.xlu0 %v279_v3, %s1018_s26  ;;  %s646_s26 = scalar_lea.hbm %s1270_s3, %s821_s30 }
  0x55   : > { %363 = vrot.lane.b32.xlu1 %v275_v2, %s1019_s24  ;;  %382 = vrot.lane.b32.xlu0 %v286_v4, %s1020_s17  ;;  %s626_s24 = scalar_lea.sflag [#allocation5], %s1177_s8 }
  0x59   : > { %335 = vrot.lane.b32.xlu1 %v279_v3, %s1021_s28  ;;  %378 = vrot.lane.b32.xlu0 %v285_v5, %s1020_s17  ;;  %s945_s17 = scalar_lea.vmem %s649_s9, 192 }
  0x5a   : > { %p946_p9 = scmp.ne.s32.totalorder %s649_s9, %s945_s17 }
  0x5c   : > { %p947_p12 = pnand %p946_p9, %p1289_p5 }
  0x5d   : > { %350 = vrot.lane.b32.xlu1 %v275_v2, %s1022_s6  ;;  %337 = vrot.lane.b32.xlu0 %v276_v1, %s1021_s28 }
  0x5e   : > { %p948_p10 = pneg %p947_p12 }
  0x61   : > { %333 = vrot.lane.b32.xlu1 %v275_v2, %s1021_s28  ;;  %352 = vrot.lane.b32.xlu0 %v286_v4, %s1022_s6  ;;  %s1027_s28 = smov [#allocation8]  }
  0x65   : > { %305 = vrot.lane.b32.xlu1 %v279_v3, %s1023_s7  ;;  %348 = vrot.lane.b32.xlu0 %v285_v5, %s1022_s6  ;;  %v587_v3 = vsub.s32 1, %v582_v63  ;;  %s949_s6 = sshll.u32 %s1027_s28, 4  ;;  %s950_s6 = int_to_ptr.vmem [resolvable:$false] %s949_s6 }
  0x66   : > { %p952_p1 = scmp.lt.s32.totalorder %s649_s9, %s950_s6 }
  0x69   : > { %320 = vrot.lane.b32.xlu1 %v275_v2, %s1024_s23  ;;  %307 = vrot.lane.b32.xlu0 %v276_v1, %s1023_s7  ;;  %v591_v1 = vsub.s32 2, %v582_v63 }
  0x6d   : > { %303 = vrot.lane.b32.xlu1 %v275_v2, %s1023_s7  ;;  %322 = vrot.lane.b32.xlu0 %v286_v4, %s1024_s23  ;;  %s951_s7 = scalar_lea.vmem %s950_s6, 384 }
  0x6e   : > { %p953_p2 = scmp.lt.s32.totalorder %s951_s7, %s945_s17 }
  0x70   : > { %p954_p0 = por %p953_p2, %p952_p1 }
  0x71   : > { %289 = vrot.lane.b32.xlu1 %v275_v2, %s1025_s16  ;;  %318 = vrot.lane.b32.xlu0 %v285_v5, %s1024_s23  ;;  %v583_v2 = vsub.s32 0, %v582_v63 }
  0x72   : > { %p955_p3 = pnand %p954_p0, %p948_p10 }
  0x75   : > { %287 = vrot.lane.b32.xlu1 %v285_v5, %s1025_s16  ;;  %291 = vrot.lane.b32.xlu0 %v286_v4, %s1025_s16 }
  0xbb   : > { %v398_v6 = vpop.permute.xlu0 %397  ;;  %v394_v7 = vpop.permute.xlu1 %393 }
  0xbc   : > { %407 = vst.msk [vmem:[#allocation2 + $0x70] sm:$0xf] %vm283_vm0, %v398_v6 }
  0xbf   : > { %v368_v8 = vpop.permute.xlu0 %367  ;;  %v381_v9 = vpop.permute.xlu1 %380 }
  0xc0   : > { %377 = vst.msk [vmem:[#allocation2 + $0x58] sm:$0xf] %vm283_vm0, %v368_v8 }
  0xc3   : > { %v366_v10 = vpop.permute.xlu1 %365  ;;  %v396_v11 = vpop.permute.xlu0 %395  ;;  %v423_v12 = vld [vmem:[#allocation2 + $0x70] sm:$0xf] }
  0xc4   : > { %v371_v13 = vsel %vm369_vm2, %v366_v10, %v368_v8  ;;  %v400_v14 = vsel %vm399_vm3, %v394_v7, %v396_v11  ;;  %v401_v15 = vsel %vm399_vm3, %v396_v11, %v398_v6  ;;  %806 = vmatpush3.msk.msra.mxu1 %vm428_vm4, %v423_v12 }
  0xc5   : > { %376 = vst [vmem:[#allocation2 + $0x50] sm:$0xf] %v371_v13  ;;  %405 = vst [vmem:[#allocation2 + $0x60] sm:$0xf] %v400_v14  ;;  %807 = vmatprep.subr.mxu1 %v1017_v0 }
  0xc6   : > { %406 = vst [vmem:[#allocation2 + $0x68] sm:$0xf] %v401_v15 }
  0xc7   : > { %v364_v16 = vpop.permute.xlu1 %363  ;;  %v383_v17 = vpop.permute.xlu0 %382 }
  0xc8   : > { %v370_v18 = vsel %vm369_vm2, %v364_v16, %v366_v10  ;;  %v386_v19 = vsel %vm384_vm6, %v381_v9, %v383_v17  ;;  %392 = vst.msk [vmem:[#allocation2 + $0x58] sm:$0xf0] %vm301_vm5, %v383_v17 }
  0xc9   : > { %375 = vst [vmem:[#allocation2 + $0x48] sm:$0xf] %v370_v18  ;;  %391 = vst [vmem:[#allocation2 + $0x50] sm:$0xf0] %v386_v19 }
  0xcb   : > { %v336_v20 = vpop.permute.xlu1 %335  ;;  %v379_v21 = vpop.permute.xlu0 %378 }
  0xcc   : > { %v385_v22 = vsel %vm384_vm6, %v379_v21, %v381_v9  ;;  %v421_v24 = vld [vmem:[#allocation2 + $0x60] sm:$0xf] }
  0xcd   : > { %v422_v23 = vld [vmem:[#allocation2 + $0x68] sm:$0xf]  ;;  %390 = vst [vmem:[#allocation2 + $0x48] sm:$0xf0] %v385_v22 }
  0xce   : > { %791 = vmatprep.subr.msk.mxu0 %vm428_vm4, %v422_v23 }
  0xcf   : > { %792 = vmatpush1.msk.msra.mxu0 %vm428_vm4, %v421_v24  ;;  %v351_v25 = vpop.permute.xlu1 %350  ;;  %v338_v26 = vpop.permute.xlu0 %337  ;;  %v420_v27 = vld [vmem:[#allocation2 + $0x58] sm:$0xff] }
  0xd0   : > { %v341_v28 = vsel %vm339_vm7, %v336_v20, %v338_v26  ;;  %347 = vst.msk [vmem:[#allocation2 + $0x40] sm:$0xf] %vm283_vm0, %v338_v26  ;;  %808 = vmatpush3.msra.mxu1 %v420_v27  ;;  %v419_v29 = vld [vmem:[#allocation2 + $0x50] sm:$0xff] }
  0xd1   : > { %346 = vst [vmem:[#allocation2 + $0x38] sm:$0xf] %v341_v28  ;;  %462 = vmatprep.subr.mxu0 %v419_v29  ;;  %809 = vmatprep.subr.mxu1 %v1017_v0 }
  0xd3   : > { %v334_v30 = vpop.permute.xlu1 %333  ;;  %v353_v31 = vpop.permute.xlu0 %352 }
  0xd4   : > { %v340_v32 = vsel %vm339_vm7, %v334_v30, %v336_v20  ;;  %v356_v33 = vsel %vm354_vm8, %v351_v25, %v353_v31  ;;  %362 = vst.msk [vmem:[#allocation2 + $0x40] sm:$0xf0] %vm301_vm5, %v353_v31  ;;  %v418_v34 = vld [vmem:[#allocation2 + $0x48] sm:$0xff] }
  0xd5   : > { %345 = vst [vmem:[#allocation2 + $0x30] sm:$0xf] %v340_v32  ;;  %361 = vst [vmem:[#allocation2 + $0x38] sm:$0xf0] %v356_v33  ;;  %463 = vmatpush1.msra.mxu0 %v418_v34 }
  0xd7   : > { %v306_v35 = vpop.permute.xlu1 %305  ;;  %v349_v36 = vpop.permute.xlu0 %348 }
  0xd8   : > { %v355_v37 = vsel %vm354_vm8, %v349_v36, %v351_v25 }
  0xd9   : > { %360 = vst [vmem:[#allocation2 + $0x30] sm:$0xf0] %v355_v37 }
  0xdb   : > { %v321_v38 = vpop.permute.xlu1 %320  ;;  %v308_v39 = vpop.permute.xlu0 %307  ;;  %v417_v40 = vld [vmem:[#allocation2 + $0x40] sm:$0xff] }
  0xdc   : > { %v311_v41 = vsel %vm309_vm9, %v306_v35, %v308_v39  ;;  %317 = vst.msk [vmem:[#allocation2 + $0x28] sm:$0xf] %vm283_vm0, %v308_v39  ;;  %810 = vmatpush3.msra.mxu1 %v417_v40  ;;  %v416_v42 = vld [vmem:[#allocation2 + $0x38] sm:$0xff] }
  0xdd   : > { %316 = vst [vmem:[#allocation2 + $0x20] sm:$0xf] %v311_v41  ;;  %464 = vmatprep.subr.mxu0 %v416_v42  ;;  %811 = vmatprep.subr.mxu1 %v1017_v0 }
  0xdf   : > { %v304_v43 = vpop.permute.xlu1 %303  ;;  %v323_v44 = vpop.permute.xlu0 %322 }
  0xe0   : > { %v310_v45 = vsel %vm309_vm9, %v304_v43, %v306_v35  ;;  %v326_v46 = vsel %vm324_vm10, %v321_v38, %v323_v44  ;;  %332 = vst.msk [vmem:[#allocation2 + $0x28] sm:$0xf0] %vm301_vm5, %v323_v44  ;;  %v415_v47 = vld [vmem:[#allocation2 + $0x30] sm:$0xff] }
  0xe1   : > { %315 = vst [vmem:[#allocation2 + $0x18] sm:$0xf] %v310_v45  ;;  %331 = vst [vmem:[#allocation2 + $0x20] sm:$0xf0] %v326_v46  ;;  %465 = vmatpush1.msra.mxu0 %v415_v47 }
  0xe3   : > { %v290_v48 = vpop.permute.xlu1 %289  ;;  %v319_v49 = vpop.permute.xlu0 %318 }
  0xe4   : > { %v325_v50 = vsel %vm324_vm10, %v319_v49, %v321_v38 }
  0xe5   : > { %330 = vst [vmem:[#allocation2 + $0x18] sm:$0xf0] %v325_v50 }
  0xe7   : > { %v288_v51 = vpop.permute.xlu1 %287  ;;  %v292_v52 = vpop.permute.xlu0 %291  ;;  %v414_v53 = vld [vmem:[#allocation2 + $0x28] sm:$0xff] }
  0xe8   : > { %v294_v54 = vsel %vm293_vm11, %v288_v51, %v290_v48  ;;  %v295_v55 = vsel %vm293_vm11, %v290_v48, %v292_v52  ;;  %302 = vst.msk [vmem:[#allocation2 + $0x10] sm:$0xf0] %vm301_vm5, %v292_v52  ;;  %812 = vmatpush3.msra.mxu1 %v414_v53  ;;  %v413_v56 = vld [vmem:[#allocation2 + $0x20] sm:$0xff] }
  0xe9   : > { %299 = vst [vmem:[#allocation2] sm:$0xf0] %v294_v54  ;;  %300 = vst [vmem:[#allocation2 + $0x8] sm:$0xf0] %v295_v55  ;;  %466 = vmatprep.subr.mxu0 %v413_v56  ;;  %813 = vmatprep.subr.mxu1 %v1017_v0  ;;  %v579_v0 = vld [vmem:[%s1269_s2] sm:$0x7] }
  0xea   : > { %v592_v4 = vrot.slane %v579_v0, %v591_v1  ;;  %v584_v5 = vrot.slane %v579_v0, %v583_v2  ;;  %v588_v7 = vrot.slane %v579_v0, %v587_v3 }
  0xec   : > { %v412_v57 = vld [vmem:[#allocation2 + $0x18] sm:$0xff] }
  0xed   : > { %467 = vmatpush1.msra.mxu0 %v412_v57 }
  0xef   : > { %v411_v58 = vld [vmem:[#allocation2 + $0x10] sm:$0xff] }
  0xf0   : > { %814 = vmatpush3.msra.mxu1 %v411_v58  ;;  %v410_v59 = vld [vmem:[#allocation2 + $0x8] sm:$0xff]  ;;  %v409_v60 = vld [vmem:[#allocation2] sm:$0xff] }
  0xf1   : > { %468 = vmatprep.subr.mxu0 %v410_v59  ;;  %816 = vmatmul.mubr.msk.f32.vlgmr.msra.gmra.mxu1 %vm424_vm12, %v408_v61 }
  0xf2   : > { %469 = vmatpush1.msra.mxu0 %v409_v60 }
  0xf3   : > { %793 = vmatmul.mubr.msk.f32.vlgmr.msra.gmra.mxu0 %vm424_vm12, %v408_v61 }
 0x1b1   : > { %v575_v6 = vpop.f32.mrf.mxu1 }
 0x1b2   : > { %v598_v8 = vmul.f32 %v592_v4, %v575_v6 }
 0x1b3   : > { %v504_v9 = vpop.f32.mrf.mxu0  ;;  %v817_v10 = vpop.f32.mrf.mxu1 }
 0x1b4   : > { %v596_v11 = vmul.f32 %v584_v5, %v504_v9  ;;  %604 = vst.msk [vmem:[%s254_s27 + $0x8] sm:$0xf] %vm283_vm0, %v598_v8  ;;  %v616_v15 = vmul.f32 %v598_v8, %v598_v8  ;;  %v608_v16 = vsel %vm283_vm0, %v598_v8, 0.0 }
 0x1b5   : > { %v506_v12 = vpop.f32.mrf.mxu0 }
 0x1b6   : > { %v614_v13 = vmul.f32 %v596_v11, %v596_v11  ;;  %v597_v14 = vmul.f32 %v588_v7, %v506_v12  ;;  %v605_v19 = vsel %vm428_vm4, %v596_v11, 0.0  ;;  %v620_v24 = vsel %vm283_vm0, %v616_v15, 0.0 }
 0x1b8   : > { %v601_v17 = vcombine.low %v596_v11, %v597_v14  ;;  %v615_v18 = vmul.f32 %v597_v14, %v597_v14  ;;  %v606_v20 = vsel %vm428_vm4, %v597_v14, 0.0  ;;  %v617_v22 = vsel %vm428_vm4, %v614_v13, 0.0 }
 0x1b9   : > { %v607_v21 = vadd.f32 %v606_v20, %v605_v19 }
 0x1ba   : > { %v618_v23 = vsel %vm428_vm4, %v615_v18, 0.0  ;;  %603 = vst [vmem:[%s254_s27] sm:$0xff] %v601_v17 }
 0x1bb   : > { %v609_v25 = vadd.f32 %v608_v16, %v607_v21  ;;  %v619_v26 = vadd.f32 %v618_v23, %v617_v22 }
 0x1bd   : > { %610 = vadd.xlane.f32.xlu0 %v609_v25  ;;  %v621_v27 = vadd.f32 %v620_v24, %v619_v26 }
 0x1bf   : > { %622 = vadd.xlane.f32.xlu1 %v621_v27 }
 0x1c0   : > { %958 = shalt.err (!%p955_p3)
}
 0x1c1   : > { %s959_s23 = scalar_lea.hbm %s646_s26, 192  ;;  %s963_s15 = scalar_lea.hbm %s1270_s3, 384 }
 0x1c2   : > { %p960_p11 = scmp.ne.s32.totalorder %s646_s26, %s959_s23  ;;  %p964_p4 = scmp.lt.s32.totalorder %s646_s26, %s1270_s3 }
 0x1c3   : > { %p965_p6 = scmp.lt.s32.totalorder %s963_s15, %s959_s23 }
 0x1c4   : > { %p961_p13 = pnand %p960_p11, %p1289_p5 }
 0x1c5   : > { %p966_p8 = por %p965_p6, %p964_p4 }
 0x1c6   : > { %p962_p7 = pneg %p961_p13 }
 0x1c8   : > { %p967_p9 = pnand %p966_p8, %p962_p7 }
 0x1ca   : > { %970 = shalt.err (!%p967_p9)
}
 0x1cb   : > { %828 = dma.vmem_to_hbm [thread:$0]  (%p1289_p5), %s649_s9, 192, %s646_s26, %s626_s24   ;;  %vm612_vm13 = vcmask 3072  }
 0x1cc   : > { %p267_p12 = scmp.lt.s32.totalorder %s1079_s22, 1 }
 0x1ce   : > { %s1297_s22 = smov (!%p267_p12, %s1079_s22), 1 }
 0x1cf   : > { %s789_s30 = sshll.u32 %s1297_s22, 2 }
 0x1d0   : > { %s270_s17 = scalar_lea.vmem %s1271_s4, %s789_s30  ;;  %s274_s7 = scalar_lea.vmem %s1272_s5, %s789_s30 }
 0x246   : > { %v611_v28 = vpop.xlane.xlu0 %610 }
 0x247   : > { %613 = vst.msk [vmem:[%s270_s17] sm:$0xf] %vm612_vm13, %v611_v28 }
 0x248   : > { %v623_v29 = vpop.xlane.xlu1 %622 }
 0x249   : > { %624 = vst.msk [vmem:[%s274_s7] sm:$0xf] %vm612_vm13, %v623_v29 }
 0x24a PF: > { %s666_s13 = sand.u32 1, %s1001_s18   ;;  %p1290_p5 = scmp.ne.s32.totalorder %s1278_s25, 0 }
 0x24b   : > { %p1291_p10 = scmp.ge.s32.totalorder %s1013_s21, 2  ;;  %s667_s22 = scalar_lea.sflag [#allocation5], %s666_s13 }
 0x24d   : > { %p839_p1 = pnand %p1291_p10, %p1290_p5 }
 0x24f   : > { %p840_p2 = pneg %p839_p1 }
 0x251   : > { %996 = dma.done.wait (%p840_p2), %s667_s22, 192  }
 0x252   : > { %998 = vsyncadd (%p840_p2), %s667_s22, 4294967104  ;;  %p20_p0 = scmp.ge.s32.totalorder %s1106_s29, 4   ;;  %s1292_s18 = smov %s1005_s19 }
 0x253   : > { %s1293_s19 = smov %s1009_s20  ;;  %s1294_s20 = smov %s1133_s12 }
 0x254   : > { %s1295_s21 = smov %s1106_s29  ;;  %22 = sbr.rel (!%p20_p0) target bundleno = 6 (0x6), region = 105 }
 0x259   :  { %686 = vsyncpa [#allocation4], 1 }
 0x25a   :  { %688 = vsyncpa [#allocation4 + $0x1], 1 }
 0x25b   :  { %689 = vsyncpa [#allocation7], 1 }
 0x25c   :  { %690 = vsyncpa [#allocation5], 1 }
 0x25d   :  { %692 = vsyncpa [#allocation5 + $0x1], 1 }

</bundles_post_ra>
